<compile_context>
chip_gen: v7x
topology: tpu7x:2x2x1
jax: 0.10.0
libtpu: 0.0.40
codegen_flags: <defaults>
</compile_context>

<pallas_src>
import functools

import jax
import jax.numpy as jnp
from jax.experimental import pallas as pl
from jax.experimental.pallas import tpu as pltpu

LANE = 128                 # fc_mu output padded to this width -> lane-dense, unmasked vst
SUBLANE_PACK = 16          # bf16 packs 2 rows/sublane -> round batch tiles to 16
DEFAULT_TM = 512           # batch tile for large B (raised from 128; kernel is step-overhead bound)
SINGLE_STEP_MAX = 1024     # collapse to grid=(1,) if the padded batch fits in this many rows
MAX_TM = 2048              # VMEM-safe tile cap across v5e/v6e/v7x at the limit below
VMEM_LIMIT_BYTES = 32 * 1024 * 1024


def _round_up(x, m):
    return ((x + m - 1) // m) * m


def _cdiv(a, b):
    return -(-a // b)


def _bf16_vpu_ok():
    """bf16 VPU/EUP math is native on v6e/v7x; v5e and older lack it -> keep f32 there."""
    try:
        kind = jax.devices()[0].device_kind.lower()
    except Exception:
        return False
    return not any(g in kind for g in ("v2", "v3", "v4", "v5"))


def actor_tanh_kernel(x_ref, w1_ref, b1_ref, w2_ref, b2_ref, w3_ref, b3_ref, o_ref,
                      *, bf16_act):
    bf = jnp.bfloat16
    # fc1: cast the narrow (TM, in) f32 tile to bf16 on the VPU; MXU matmul, f32 accumulate.
    h1 = jnp.dot(x_ref[...].astype(bf), w1_ref[...], preferred_element_type=jnp.float32)
    if bf16_act:   # v6e/v7x: bf16 bias-add + ReLU (halves VPU ops and vreg pressure)
        h1 = jnp.maximum(h1.astype(bf) + b1_ref[...].astype(bf), 0)
    else:          # v5e: f32 VPU path, cast to bf16 only for the next MXU op
        h1 = jnp.maximum(h1 + b1_ref[...], 0.0).astype(bf)
    # fc2 + ReLU
    h2 = jnp.dot(h1, w2_ref[...], preferred_element_type=jnp.float32)
    if bf16_act:
        h2 = jnp.maximum(h2.astype(bf) + b2_ref[...].astype(bf), 0)
    else:
        h2 = jnp.maximum(h2 + b2_ref[...], 0.0).astype(bf)
    # fc_mu + tanh: final bias-add and tanh in f32, store into the lane-dense bf16 slab.
    mu = jnp.dot(h2, w3_ref[...], preferred_element_type=jnp.float32) + b3_ref[...]
    o_ref[...] = jnp.tanh(mu).astype(o_ref.dtype)


def prepare_params(w1, b1, w2, b2, w3, b3):
    """One-time preprocessing (outside the hot loop): bf16-cast matmul weights, pad the
    fc_mu weight/bias to a lane-dense (multiple-of-128) output width. Biases stay f32
    (cast in-kernel on bf16-VPU parts)."""
    out_size = w3.shape[1]
    n_pad = _round_up(max(out_size, LANE), LANE)
    w3p = jnp.zeros((w3.shape[0], n_pad), jnp.float32).at[:, :out_size].set(w3)
    b3p = jnp.zeros((1, n_pad), jnp.float32).at[:, :out_size].set(b3.reshape(1, -1))
    params = (
        w1.astype(jnp.bfloat16), b1.reshape(1, -1).astype(jnp.float32),
        w2.astype(jnp.bfloat16), b2.reshape(1, -1).astype(jnp.float32),
        w3p.astype(jnp.bfloat16), b3p.astype(jnp.float32),
    )
    return params, out_size


def _choose_tile(B, tm):
    """Return (tm_eff, n_steps). Whole batch in a single grid step when it fits the VMEM
    budget; otherwise an EVEN number of steps so the 'parallel' batch axis shards across
    v7x's two TensorCores."""
    b_one = _round_up(B, SUBLANE_PACK)
    if b_one <= max(SINGLE_STEP_MAX, tm):
        return b_one, 1
    n_steps = _cdiv(B, tm)
    if n_steps % 2:
        n_steps += 1
    tm_eff = _round_up(_cdiv(B, n_steps), SUBLANE_PACK)
    return tm_eff, n_steps


def actor_tanh(x, params, out_size, tm=DEFAULT_TM):
    w1, b1, w2, b2, w3, b3 = params
    B, d_in = x.shape
    n_pad = w3.shape[1]
    tm = min(tm, MAX_TM)

    tm_eff, n_steps = _choose_tile(B, tm)
    b_pad = tm_eff * n_steps
    xp = jnp.pad(x, ((0, b_pad - B), (0, 0))) if b_pad != B else x
    xp = xp.astype(jnp.float32)   # bf16 cast happens in-kernel (x is only d_in lanes wide)

    kernel = functools.partial(actor_tanh_kernel, bf16_act=_bf16_vpu_ok())

    def call(single_buffer_weights):
        if single_buffer_weights:
            # Constant-index blocks stay VMEM-resident; no need for a second pipeline buffer.
            const2d = lambda a: pl.BlockSpec(a.shape, lambda i: (0, 0),
                                             pipeline_mode=pl.Buffered(1))
        else:
            const2d = lambda a: pl.BlockSpec(a.shape, lambda i: (0, 0))
        return pl.pallas_call(
            kernel,
            out_shape=jax.ShapeDtypeStruct((b_pad, n_pad), jnp.bfloat16),
            grid=(n_steps,),
            in_specs=[
                pl.BlockSpec((tm_eff, d_in), lambda i: (i, 0)),
                const2d(w1), const2d(b1),
                const2d(w2), const2d(b2),
                const2d(w3), const2d(b3),
            ],
            out_specs=pl.BlockSpec((tm_eff, n_pad), lambda i: (i, 0)),
            compiler_params=pltpu.CompilerParams(
                dimension_semantics=("parallel",),
                vmem_limit_bytes=VMEM_LIMIT_BYTES),
        )(xp, w1, b1, w2, b2, w3, b3)

    try:
        out = call(True)
    except Exception:
        # pl.Buffered(1) pipeline_mode not supported by this jax/backend -> default buffering.
        out = call(False)

    # Rows >= B / columns >= out_size of the padded slab are garbage; slice them off and
    # restore the module's f32 output dtype (cheap: only (B, out_size) elements).
    return out[:B, :out_size].astype(jnp.float32)


def init_linear(key, fan_in, fan_out):
    # PyTorch nn.Linear default init: U(-1/sqrt(fan_in), 1/sqrt(fan_in)) for both W and b.
    kw, kb = jax.random.split(key)
    bound = 1.0 / jnp.sqrt(fan_in)
    w = jax.random.uniform(kw, (fan_in, fan_out), jnp.float32, -bound, bound)
    b = jax.random.uniform(kb, (1, fan_out), jnp.float32, -bound, bound)
    return w, b


def ref_forward_mixed(x, w1, b1, w2, b2, w3, b3, bf16_act):
    """Reference with the same bf16-operand / f32-accumulate precision as the kernel."""
    bf = jnp.bfloat16
    h1 = jnp.dot(x.astype(bf), w1.astype(bf), preferred_element_type=jnp.float32)
    h1 = (jnp.maximum(h1.astype(bf) + b1.astype(bf), 0) if bf16_act
          else jnp.maximum(h1 + b1, 0.0).astype(bf))
    h2 = jnp.dot(h1, w2.astype(bf), preferred_element_type=jnp.float32)
    h2 = (jnp.maximum(h2.astype(bf) + b2.astype(bf), 0) if bf16_act
          else jnp.maximum(h2 + b2, 0.0).astype(bf))
    mu = jnp.dot(h2, w3.astype(bf), preferred_element_type=jnp.float32) + b3
    return jnp.tanh(mu)


if __name__ == "__main__":
    key = jax.random.PRNGKey(0)
    k1, k2, k3, kx_small, kx_mid, kx_big = jax.random.split(key, 6)

    input_size, hidden, output_size = 32, 256, 8
    w1, b1 = init_linear(k1, input_size, hidden)
    w2, b2 = init_linear(k2, hidden, hidden)
    w3, b3 = init_linear(k3, hidden, output_size)

    params, out_size = prepare_params(w1, b1, w2, b2, w3, b3)
    bf16_act = _bf16_vpu_ok()

    # Exercise: tiny batch (single 16-row step), mid batch (single-step whole-batch tile),
    # and a large batch that triggers the multi-step even grid (4 x 288 rows).
    for kx, batch in ((kx_small, 8), (kx_mid, 200), (kx_big, 1100)):
        x = jax.random.normal(kx, (batch, input_size), jnp.float32)
        out = actor_tanh(x, params, out_size)
        jax.block_until_ready(out)
        assert out.shape == (batch, output_size)

        # Tight check against a precision-matched (bf16 operands, f32 accumulate) reference;
        # tolerance covers the bf16 output store (~2e-3) plus accumulation-order noise.
        ref_mixed = ref_forward_mixed(x, w1, b1, w2, b2, w3, b3, bf16_act)
        assert jnp.allclose(out, ref_mixed, atol=4e-3, rtol=4e-3), "mismatch vs mixed-precision ref"

        # Loose sanity check against the full-f32 PyTorch-equivalent forward.
        ref_f32 = jnp.tanh(
            jnp.maximum(jnp.maximum(x @ w1 + b1, 0.0) @ w2 + b2, 0.0) @ w3 + b3)
        assert jnp.allclose(out, ref_f32, atol=4e-2), "mismatch vs f32 reference"

    print("KERNEL_OK")
</pallas_src>

<mosaic_0001>
module attributes {stable_mosaic.version = 11 : i64} {
  func.func @actor_tanh_kernel(%arg0: i32, %arg1: memref<16x32xf32, #tpu.memory_space<vmem>>, %arg2: memref<32x256xbf16, #tpu.memory_space<vmem>>, %arg3: memref<1x256xf32, #tpu.memory_space<vmem>>, %arg4: memref<256x256xbf16, #tpu.memory_space<vmem>>, %arg5: memref<1x256xf32, #tpu.memory_space<vmem>>, %arg6: memref<256x128xbf16, #tpu.memory_space<vmem>>, %arg7: memref<1x128xf32, #tpu.memory_space<vmem>>, %arg8: memref<16x128xbf16, #tpu.memory_space<vmem>>) attributes {dimension_semantics = [#tpu.dimension_semantics<parallel>], iteration_bounds = array<i64: 1>, scalar_prefetch = 0 : i64, scratch_operands = 0 : i64, tpu.core_type = #tpu.core_type<tc>, window_params = [{transform_indices = @transform_0, window_bounds = array<i64: 16, 32>}, {pipeline_mode = #tpu.pipeline_mode<synchronous>, transform_indices = @transform_1, window_bounds = array<i64: 32, 256>}, {pipeline_mode = #tpu.pipeline_mode<synchronous>, transform_indices = @transform_2, window_bounds = array<i64: 1, 256>}, {pipeline_mode = #tpu.pipeline_mode<synchronous>, transform_indices = @transform_3, window_bounds = array<i64: 256, 256>}, {pipeline_mode = #tpu.pipeline_mode<synchronous>, transform_indices = @transform_4, window_bounds = array<i64: 1, 256>}, {pipeline_mode = #tpu.pipeline_mode<synchronous>, transform_indices = @transform_5, window_bounds = array<i64: 256, 128>}, {pipeline_mode = #tpu.pipeline_mode<synchronous>, transform_indices = @transform_6, window_bounds = array<i64: 1, 128>}, {transform_indices = @transform_7, window_bounds = array<i64: 16, 128>}]} {
    %c0 = arith.constant 0 : index
    %c0_0 = arith.constant 0 : index
    %0 = vector.load %arg1[%c0, %c0_0] : memref<16x32xf32, #tpu.memory_space<vmem>>, vector<16x32xf32>
    %1 = arith.truncf %0 : vector<16x32xf32> to vector<16x32xbf16>
    %c0_1 = arith.constant 0 : index
    %c0_2 = arith.constant 0 : index
    %2 = vector.load %arg2[%c0_1, %c0_2] : memref<32x256xbf16, #tpu.memory_space<vmem>>, vector<32x256xbf16>
    %cst = arith.constant dense<0.000000e+00> : vector<16x256xf32>
    %3 = tpu.matmul %1, %2, %cst {dimension_numbers = #tpu.dot_dimension_numbers<[1], [0], [0], [1], [0, 0, 1, 1], [], []>} : vector<16x32xbf16>, vector<32x256xbf16>, vector<16x256xf32> -> vector<16x256xf32>
    %4 = arith.truncf %3 : vector<16x256xf32> to vector<16x256xbf16>
    %c0_3 = arith.constant 0 : index
    %c0_4 = arith.constant 0 : index
    %5 = vector.load %arg3[%c0_3, %c0_4] : memref<1x256xf32, #tpu.memory_space<vmem>>, vector<1x256xf32>
    %6 = arith.truncf %5 : vector<1x256xf32> to vector<1x256xbf16>
    %7 = vector.broadcast %6 : vector<1x256xbf16> to vector<16x256xbf16>
    %8 = arith.addf %4, %7 : vector<16x256xbf16>
    %cst_5 = arith.constant 0.000000e+00 : bf16
    %9 = vector.broadcast %cst_5 : bf16 to vector<16x256xbf16>
    %10 = arith.maximumf %8, %9 : vector<16x256xbf16>
    %c0_6 = arith.constant 0 : index
    %c0_7 = arith.constant 0 : index
    %11 = vector.load %arg4[%c0_6, %c0_7] : memref<256x256xbf16, #tpu.memory_space<vmem>>, vector<256x256xbf16>
    %cst_8 = arith.constant dense<0.000000e+00> : vector<16x256xf32>
    %12 = tpu.matmul %10, %11, %cst_8 {dimension_numbers = #tpu.dot_dimension_numbers<[1], [0], [0], [1], [0, 0, 1, 1], [], []>} : vector<16x256xbf16>, vector<256x256xbf16>, vector<16x256xf32> -> vector<16x256xf32>
    %13 = arith.truncf %12 : vector<16x256xf32> to vector<16x256xbf16>
    %c0_9 = arith.constant 0 : index
    %c0_10 = arith.constant 0 : index
    %14 = vector.load %arg5[%c0_9, %c0_10] : memref<1x256xf32, #tpu.memory_space<vmem>>, vector<1x256xf32>
    %15 = arith.truncf %14 : vector<1x256xf32> to vector<1x256xbf16>
    %16 = vector.broadcast %15 : vector<1x256xbf16> to vector<16x256xbf16>
    %17 = arith.addf %13, %16 : vector<16x256xbf16>
    %cst_11 = arith.constant 0.000000e+00 : bf16
    %18 = vector.broadcast %cst_11 : bf16 to vector<16x256xbf16>
    %19 = arith.maximumf %17, %18 : vector<16x256xbf16>
    %c0_12 = arith.constant 0 : index
    %c0_13 = arith.constant 0 : index
    %20 = vector.load %arg6[%c0_12, %c0_13] : memref<256x128xbf16, #tpu.memory_space<vmem>>, vector<256x128xbf16>
    %cst_14 = arith.constant dense<0.000000e+00> : vector<16x128xf32>
    %21 = tpu.matmul %19, %20, %cst_14 {dimension_numbers = #tpu.dot_dimension_numbers<[1], [0], [0], [1], [0, 0, 1, 1], [], []>} : vector<16x256xbf16>, vector<256x128xbf16>, vector<16x128xf32> -> vector<16x128xf32>
    %c0_15 = arith.constant 0 : index
    %c0_16 = arith.constant 0 : index
    %22 = vector.load %arg7[%c0_15, %c0_16] : memref<1x128xf32, #tpu.memory_space<vmem>>, vector<1x128xf32>
    %23 = vector.broadcast %22 : vector<1x128xf32> to vector<16x128xf32>
    %24 = arith.addf %21, %23 : vector<16x128xf32>
    %25 = math.tanh %24 : vector<16x128xf32>
    %26 = arith.truncf %25 : vector<16x128xf32> to vector<16x128xbf16>
    %c0_17 = arith.constant 0 : index
    %c0_18 = arith.constant 0 : index
    %27 = vector.load %arg8[%c0_17, %c0_18] : memref<16x128xbf16, #tpu.memory_space<vmem>>, vector<16x128xbf16>
    tpu.vector_store %arg8[%c0_17, %c0_18], %26 {strides = array<i32>} : memref<16x128xbf16, #tpu.memory_space<vmem>>, vector<16x128xbf16>,
    return
  }
  func.func @transform_0(%arg0: i32) -> (i32, i32) {
    %c0_i32 = arith.constant 0 : i32
    %c0_i32_0 = arith.constant 0 : i32
    return %arg0, %c0_i32 : i32, i32
  }
  func.func @transform_1(%arg0: i32) -> (i32, i32) {
    %c0_i32 = arith.constant 0 : i32
    %c0_i32_0 = arith.constant 0 : i32
    %c0_i32_1 = arith.constant 0 : i32
    return %c0_i32, %c0_i32_0 : i32, i32
  }
  func.func @transform_2(%arg0: i32) -> (i32, i32) {
    %c0_i32 = arith.constant 0 : i32
    %c0_i32_0 = arith.constant 0 : i32
    %c0_i32_1 = arith.constant 0 : i32
    return %c0_i32, %c0_i32_0 : i32, i32
  }
  func.func @transform_3(%arg0: i32) -> (i32, i32) {
    %c0_i32 = arith.constant 0 : i32
    %c0_i32_0 = arith.constant 0 : i32
    %c0_i32_1 = arith.constant 0 : i32
    return %c0_i32, %c0_i32_0 : i32, i32
  }
  func.func @transform_4(%arg0: i32) -> (i32, i32) {
    %c0_i32 = arith.constant 0 : i32
    %c0_i32_0 = arith.constant 0 : i32
    %c0_i32_1 = arith.constant 0 : i32
    return %c0_i32, %c0_i32_0 : i32, i32
  }
  func.func @transform_5(%arg0: i32) -> (i32, i32) {
    %c0_i32 = arith.constant 0 : i32
    %c0_i32_0 = arith.constant 0 : i32
    %c0_i32_1 = arith.constant 0 : i32
    return %c0_i32, %c0_i32_0 : i32, i32
  }
  func.func @transform_6(%arg0: i32) -> (i32, i32) {
    %c0_i32 = arith.constant 0 : i32
    %c0_i32_0 = arith.constant 0 : i32
    %c0_i32_1 = arith.constant 0 : i32
    return %c0_i32, %c0_i32_0 : i32, i32
  }
  func.func @transform_7(%arg0: i32) -> (i32, i32) {
    %c0_i32 = arith.constant 0 : i32
    %c0_i32_0 = arith.constant 0 : i32
    return %arg0, %c0_i32 : i32, i32
  }
}

module attributes {stable_mosaic.version = 11 : i64} {
  func.func @actor_tanh_kernel(%arg0: i32, %arg1: memref<16x32xf32, #tpu.memory_space<vmem>>, %arg2: memref<32x256xbf16, #tpu.memory_space<vmem>>, %arg3: memref<1x256xf32, #tpu.memory_space<vmem>>, %arg4: memref<256x256xbf16, #tpu.memory_space<vmem>>, %arg5: memref<1x256xf32, #tpu.memory_space<vmem>>, %arg6: memref<256x128xbf16, #tpu.memory_space<vmem>>, %arg7: memref<1x128xf32, #tpu.memory_space<vmem>>, %arg8: memref<16x128xbf16, #tpu.memory_space<vmem>>) attributes {dimension_semantics = [#tpu.dimension_semantics<parallel>], iteration_bounds = array<i64: 1>, scalar_prefetch = 0 : i64, scratch_operands = 0 : i64, tpu.core_type = #tpu.core_type<tc>, window_params = [{transform_indices = @transform_0, window_bounds = array<i64: 16, 32>}, {pipeline_mode = #tpu.pipeline_mode<synchronous>, transform_indices = @transform_1, window_bounds = array<i64: 32, 256>}, {pipeline_mode = #tpu.pipeline_mode<synchronous>, transform_indices = @transform_2, window_bounds = array<i64: 1, 256>}, {pipeline_mode = #tpu.pipeline_mode<synchronous>, transform_indices = @transform_3, window_bounds = array<i64: 256, 256>}, {pipeline_mode = #tpu.pipeline_mode<synchronous>, transform_indices = @transform_4, window_bounds = array<i64: 1, 256>}, {pipeline_mode = #tpu.pipeline_mode<synchronous>, transform_indices = @transform_5, window_bounds = array<i64: 256, 128>}, {pipeline_mode = #tpu.pipeline_mode<synchronous>, transform_indices = @transform_6, window_bounds = array<i64: 1, 128>}, {transform_indices = @transform_7, window_bounds = array<i64: 16, 128>}]} {
    %c0 = arith.constant 0 : index
    %c0_0 = arith.constant 0 : index
    %0 = vector.load %arg1[%c0, %c0_0] : memref<16x32xf32, #tpu.memory_space<vmem>>, vector<16x32xf32>
    %1 = arith.truncf %0 : vector<16x32xf32> to vector<16x32xbf16>
    %c0_1 = arith.constant 0 : index
    %c0_2 = arith.constant 0 : index
    %2 = vector.load %arg2[%c0_1, %c0_2] : memref<32x256xbf16, #tpu.memory_space<vmem>>, vector<32x256xbf16>
    %cst = arith.constant dense<0.000000e+00> : vector<16x256xf32>
    %3 = tpu.matmul %1, %2, %cst {dimension_numbers = #tpu.dot_dimension_numbers<[1], [0], [0], [1], [0, 0, 1, 1], [], []>} : vector<16x32xbf16>, vector<32x256xbf16>, vector<16x256xf32> -> vector<16x256xf32>
    %4 = arith.truncf %3 : vector<16x256xf32> to vector<16x256xbf16>
    %c0_3 = arith.constant 0 : index
    %c0_4 = arith.constant 0 : index
    %5 = vector.load %arg3[%c0_3, %c0_4] : memref<1x256xf32, #tpu.memory_space<vmem>>, vector<1x256xf32>
    %6 = arith.truncf %5 : vector<1x256xf32> to vector<1x256xbf16>
    %7 = vector.broadcast %6 : vector<1x256xbf16> to vector<16x256xbf16>
    %8 = arith.addf %4, %7 : vector<16x256xbf16>
    %cst_5 = arith.constant 0.000000e+00 : bf16
    %9 = vector.broadcast %cst_5 : bf16 to vector<16x256xbf16>
    %10 = arith.maximumf %8, %9 : vector<16x256xbf16>
    %c0_6 = arith.constant 0 : index
    %c0_7 = arith.constant 0 : index
    %11 = vector.load %arg4[%c0_6, %c0_7] : memref<256x256xbf16, #tpu.memory_space<vmem>>, vector<256x256xbf16>
    %cst_8 = arith.constant dense<0.000000e+00> : vector<16x256xf32>
    %12 = tpu.matmul %10, %11, %cst_8 {dimension_numbers = #tpu.dot_dimension_numbers<[1], [0], [0], [1], [0, 0, 1, 1], [], []>} : vector<16x256xbf16>, vector<256x256xbf16>, vector<16x256xf32> -> vector<16x256xf32>
    %13 = arith.truncf %12 : vector<16x256xf32> to vector<16x256xbf16>
    %c0_9 = arith.constant 0 : index
    %c0_10 = arith.constant 0 : index
    %14 = vector.load %arg5[%c0_9, %c0_10] : memref<1x256xf32, #tpu.memory_space<vmem>>, vector<1x256xf32>
    %15 = arith.truncf %14 : vector<1x256xf32> to vector<1x256xbf16>
    %16 = vector.broadcast %15 : vector<1x256xbf16> to vector<16x256xbf16>
    %17 = arith.addf %13, %16 : vector<16x256xbf16>
    %cst_11 = arith.constant 0.000000e+00 : bf16
    %18 = vector.broadcast %cst_11 : bf16 to vector<16x256xbf16>
    %19 = arith.maximumf %17, %18 : vector<16x256xbf16>
    %c0_12 = arith.constant 0 : index
    %c0_13 = arith.constant 0 : index
    %20 = vector.load %arg6[%c0_12, %c0_13] : memref<256x128xbf16, #tpu.memory_space<vmem>>, vector<256x128xbf16>
    %cst_14 = arith.constant dense<0.000000e+00> : vector<16x128xf32>
    %21 = tpu.matmul %19, %20, %cst_14 {dimension_numbers = #tpu.dot_dimension_numbers<[1], [0], [0], [1], [0, 0, 1, 1], [], []>} : vector<16x256xbf16>, vector<256x128xbf16>, vector<16x128xf32> -> vector<16x128xf32>
    %c0_15 = arith.constant 0 : index
    %c0_16 = arith.constant 0 : index
    %22 = vector.load %arg7[%c0_15, %c0_16] : memref<1x128xf32, #tpu.memory_space<vmem>>, vector<1x128xf32>
    %23 = vector.broadcast %22 : vector<1x128xf32> to vector<16x128xf32>
    %24 = arith.addf %21, %23 : vector<16x128xf32>
    %25 = math.tanh %24 : vector<16x128xf32>
    %26 = arith.truncf %25 : vector<16x128xf32> to vector<16x128xbf16>
    %c0_17 = arith.constant 0 : index
    %c0_18 = arith.constant 0 : index
    %27 = vector.load %arg8[%c0_17, %c0_18] : memref<16x128xbf16, #tpu.memory_space<vmem>>, vector<16x128xbf16>
    tpu.vector_store %arg8[%c0_17, %c0_18], %26 {strides = array<i32>} : memref<16x128xbf16, #tpu.memory_space<vmem>>, vector<16x128xbf16>,
    return
  }
  func.func @transform_0(%arg0: i32) -> (i32, i32) {
    %c0_i32 = arith.constant 0 : i32
    %c0_i32_0 = arith.constant 0 : i32
    return %arg0, %c0_i32 : i32, i32
  }
  func.func @transform_1(%arg0: i32) -> (i32, i32) {
    %c0_i32 = arith.constant 0 : i32
    %c0_i32_0 = arith.constant 0 : i32
    %c0_i32_1 = arith.constant 0 : i32
    return %c0_i32, %c0_i32_0 : i32, i32
  }
  func.func @transform_2(%arg0: i32) -> (i32, i32) {
    %c0_i32 = arith.constant 0 : i32
    %c0_i32_0 = arith.constant 0 : i32
    %c0_i32_1 = arith.constant 0 : i32
    return %c0_i32, %c0_i32_0 : i32, i32
  }
  func.func @transform_3(%arg0: i32) -> (i32, i32) {
    %c0_i32 = arith.constant 0 : i32
    %c0_i32_0 = arith.constant 0 : i32
    %c0_i32_1 = arith.constant 0 : i32
    return %c0_i32, %c0_i32_0 : i32, i32
  }
  func.func @transform_4(%arg0: i32) -> (i32, i32) {
    %c0_i32 = arith.constant 0 : i32
    %c0_i32_0 = arith.constant 0 : i32
    %c0_i32_1 = arith.constant 0 : i32
    return %c0_i32, %c0_i32_0 : i32, i32
  }
  func.func @transform_5(%arg0: i32) -> (i32, i32) {
    %c0_i32 = arith.constant 0 : i32
    %c0_i32_0 = arith.constant 0 : i32
    %c0_i32_1 = arith.constant 0 : i32
    return %c0_i32, %c0_i32_0 : i32, i32
  }
  func.func @transform_6(%arg0: i32) -> (i32, i32) {
    %c0_i32 = arith.constant 0 : i32
    %c0_i32_0 = arith.constant 0 : i32
    %c0_i32_1 = arith.constant 0 : i32
    return %c0_i32, %c0_i32_0 : i32, i32
  }
  func.func @transform_7(%arg0: i32) -> (i32, i32) {
    %c0_i32 = arith.constant 0 : i32
    %c0_i32_0 = arith.constant 0 : i32
    return %arg0, %c0_i32 : i32, i32
  }
}

</mosaic_0001>

<bundles_post_ra>
// kernel: tpu_custom_call.1
= control target key start
LH: loop header
LB: loop body
LE: loop exit
PB: predicated region body
PF: predicated region fallthrough
CT: control target
= control target key end

     0   :  { %12 = vsyncpa [#allocation3], 0  ;;  %s1107_s0 = inlined_call_operand.hbm [shape: f32[16,32], index: 0, kind: input, shape index: {}]   ;;  %s1108_s1 = inlined_call_operand.hbm [shape: bf16[32,256], index: 1, kind: input, shape index: {}]   ;;  %s1109_s2 = inlined_call_operand.vmem [shape: f32[1,256], index: 2, kind: input, shape index: {}]   ;;  %s1110_s3 = inlined_call_operand.hbm [shape: bf16[256,256], index: 3, kind: input, shape index: {}]   ;;  %s1111_s4 = inlined_call_operand.vmem [shape: f32[1,256], index: 4, kind: input, shape index: {}]   ;;  %s1112_s5 = inlined_call_operand.hbm [shape: bf16[256,128], index: 5, kind: input, shape index: {}]   ;;  %s1113_s6 = inlined_call_operand.vmem [shape: f32[1,128], index: 6, kind: input, shape index: {}]   ;;  %s1114_s7 = inlined_call_operand.hbm [shape: bf16[16,128], index: 7, kind: output, shape index: {}]  }
   0x1   :  { %13 = vsyncpa [#allocation6], 0 }
   0x2   :  { %14 = vsyncpa [#allocation9], 0 }
   0x3   :  { %15 = vsyncpa [#allocation4], 0  ;;  %s954_s24 = smov [#allocation5]   ;;  %s955_s26 = smov [#allocation2]  }
   0x4   :  { %s33_s25 = sshll.u32 %s954_s24, 4  ;;  %s21_s27 = sshll.u32 %s955_s26, 4  ;;  %s34_s25 = int_to_ptr.vmem [resolvable:$true] %s33_s25  ;;  %s1004_s27 = int_to_ptr.vmem [resolvable:$true] %s21_s27 }
   0x5   :  { %s836_s30 = scalar_lea.hbm %s1108_s1, 512 }
   0x6   :  { %p837_p0 = scmp.ne.s32.totalorder %s1108_s1, %s836_s30  ;;  %p840_p1 = scmp.lt.u32.totalorder %s836_s30, %s1108_s1 }
   0x8   :  { %p842_p2 = pnand %p840_p1, %p837_p0 }
   0xa   :  { %845 = shalt.err (!%p842_p2)
}
   0xb   :  { %s846_s12 = scalar_lea.vmem %s34_s25, 512  ;;  %p851_p4 = scmp.lt.s32.totalorder %s34_s25, %s34_s25 }
   0xc   :  { %p847_p3 = scmp.ne.s32.totalorder %s34_s25, %s846_s12  ;;  %p852_p5 = scmp.lt.s32.totalorder %s846_s12, %s846_s12 }
   0xe   :  { %p853_p6 = por %p852_p5, %p851_p4 }
  0x10   :  { %p854_p7 = pnand %p853_p6, %p847_p3 }
  0x12   :  { %857 = shalt.err (!%p854_p7)
}
  0x13   :  { %s956_s13 = smov 128   ;;  %s957_s14 = smov 8  }
  0x14   :  { %39 = dma.hbm_to_vmem [thread:$0]  %s1108_s1, 512, %s34_s25, [#allocation6], %s956_s13, %s956_s13, %s957_s14  }
  0x15   :  { %s858_s19 = scalar_lea.hbm %s1107_s0, 256 }
  0x16   :  { %p859_p8 = scmp.ne.s32.totalorder %s1107_s0, %s858_s19  ;;  %p862_p9 = scmp.lt.u32.totalorder %s858_s19, %s1107_s0 }
  0x18   :  { %p864_p10 = pnand %p862_p9, %p859_p8 }
  0x1a   :  { %867 = shalt.err (!%p864_p10)
}
  0x1b   :  { %s868_s24 = scalar_lea.vmem %s1004_s27, 256  ;;  %p873_p12 = scmp.lt.s32.totalorder %s1004_s27, %s1004_s27 }
  0x1c   :  { %p869_p11 = scmp.ne.s32.totalorder %s1004_s27, %s868_s24  ;;  %p874_p13 = scmp.lt.s32.totalorder %s868_s24, %s868_s24 }
  0x1e   :  { %p875_p0 = por %p874_p13, %p873_p12 }
  0x20   :  { %p876_p1 = pnand %p875_p0, %p869_p11 }
  0x22   :  { %879 = shalt.err (!%p876_p1)
}
  0x23   :  { %27 = dma.hbm_to_vmem [thread:$0]  %s1107_s0, 256, %s1004_s27, [#allocation3], %s956_s13, %s956_s13, %s957_s14  }
  0x24   :  { %s958_s26 = smov [#allocation7]   ;;  %s959_s29 = smov [#allocation8]  }
  0x25   :  { %s47_s28 = sshll.u32 %s958_s26, 4  ;;  %s61_s30 = sshll.u32 %s959_s29, 4  ;;  %s48_s28 = int_to_ptr.vmem [resolvable:$true] %s47_s28  ;;  %s1041_s30 = int_to_ptr.vmem [resolvable:$true] %s61_s30 }
  0x26   :  { %s880_s10 = scalar_lea.hbm %s1110_s3, 4096 }
  0x27   :  { %p881_p2 = scmp.ne.s32.totalorder %s1110_s3, %s880_s10  ;;  %p884_p3 = scmp.lt.u32.totalorder %s880_s10, %s1110_s3 }
  0x29   :  { %p886_p4 = pnand %p884_p3, %p881_p2 }
  0x2b   :  { %889 = shalt.err (!%p886_p4)
}
  0x2c   :  { %s890_s0 = scalar_lea.vmem %s48_s28, 4096  ;;  %p895_p6 = scmp.lt.s32.totalorder %s48_s28, %s48_s28 }
  0x2d   :  { %p891_p5 = scmp.ne.s32.totalorder %s48_s28, %s890_s0  ;;  %p896_p7 = scmp.lt.s32.totalorder %s890_s0, %s890_s0 }
  0x2f   :  { %p897_p8 = por %p896_p7, %p895_p6 }
  0x31   :  { %p898_p9 = pnand %p897_p8, %p891_p5 }
  0x33   :  { %901 = shalt.err (!%p898_p9)
}
  0x34   :  { %53 = dma.hbm_to_vmem [thread:$0]  %s1110_s3, 4096, %s48_s28, [#allocation6], %s956_s13, %s956_s13, %s957_s14  }
  0x35   :  { %s902_s20 = scalar_lea.hbm %s1112_s5, 2048 }
  0x36   :  { %p903_p10 = scmp.ne.s32.totalorder %s1112_s5, %s902_s20  ;;  %p906_p11 = scmp.lt.u32.totalorder %s902_s20, %s1112_s5 }
  0x38   :  { %p908_p12 = pnand %p906_p11, %p903_p10 }
  0x3a   :  { %911 = shalt.err (!%p908_p12)
}
  0x3b   :  { %s912_s1 = scalar_lea.vmem %s1041_s30, 2048  ;;  %p917_p0 = scmp.lt.s32.totalorder %s1041_s30, %s1041_s30 }
  0x3c   :  { %p913_p13 = scmp.ne.s32.totalorder %s1041_s30, %s912_s1  ;;  %p918_p1 = scmp.lt.s32.totalorder %s912_s1, %s912_s1 }
  0x3e   :  { %p919_p2 = por %p918_p1, %p917_p0 }
  0x40   :  { %p920_p3 = pnand %p919_p2, %p913_p13 }
  0x42   :  { %923 = shalt.err (!%p920_p3)
}
  0x43   :  { %s960_s3 = smov 64   ;;  %s961_s13 = smov 4  }
  0x44   :  { %67 = dma.hbm_to_vmem [thread:$0]  %s1112_s5, 2048, %s1041_s30, [#allocation9], %s960_s3, %s960_s3, %s961_s13  }
  0x45   :  { %946 = dma.done.wait [#allocation3], 256  }
  0x46   :  { %947 = vsyncadd [#allocation3], 4294967040 }
  0x47   :  { %948 = dma.done.wait [#allocation6], 4608  }
  0x48   :  { %949 = vsyncadd [#allocation6], 4294962688 }
  0x49   :  { %950 = dma.done.wait [#allocation9], 2048  }
  0x4a   :  { %951 = vsyncadd [#allocation9], 4294965248  ;;  %v962_v0 = vmov 0   ;;  %v762_v1 = vld [vmem:[#allocation5 + $0x4] ss:$8 sps:$4 sm:$0xff]   ;;  %v83_v5 = vld [vmem:[#allocation2] sm:$0xff]  ;;  %v161_v51 = vlaneseq }
  0x4b   :  { %146 = vmatprep.mubr.bf16.mxu0 %v962_v0  ;;  %v764_v2 = vld [vmem:[#allocation5] ss:$8 sps:$4 sm:$0xff]   ;;  %114 = vmatprep.subr.bf16.mxu0 %v762_v1  ;;  %v765_v3 = vld [vmem:[#allocation5 + $0x14] ss:$8 sps:$4 sm:$0xff]   ;;  %v767_v4 = vld [vmem:[#allocation5 + $0x10] ss:$8 sps:$4 sm:$0xff]  }
  0x4c   :  { %115 = vmatpush1.bf16.msra.mxu0 %v764_v2  ;;  %v84_v6 = vld [vmem:[#allocation2 + $0x8] sm:$0xff]  ;;  %v768_v7 = vld [vmem:[#allocation7 + $0x4] ss:$8 sps:$4 sm:$0xff]   ;;  %v770_v8 = vld [vmem:[#allocation7] ss:$8 sps:$4 sm:$0xff]   ;;  %vm110_vm0 = vcmask 261120  }
  0x4d   :  { %116 = vmatprep.subr.bf16.mxu0 %v765_v3  ;;  %v771_v9 = vld [vmem:[#allocation7 + $0x14] ss:$8 sps:$4 sm:$0xff]   ;;  %v85_v10 = vpack.c.bf16 %v84_v6, %v83_v5  ;;  %383 = vmatprep.subr.bf16.mxu1 %v768_v7  ;;  %v773_v11 = vld [vmem:[#allocation7 + $0x10] ss:$8 sps:$4 sm:$0xff]   ;;  %v774_v12 = vld [vmem:[#allocation7 + $0x24] ss:$8 sps:$4 sm:$0xff]  }
  0x4e   :  { %384 = vmatpush1.bf16.msra.mxu1 %v770_v8  ;;  %v776_v13 = vld [vmem:[#allocation7 + $0x20] ss:$8 sps:$4 sm:$0xff]   ;;  %v777_v14 = vld [vmem:[#allocation7 + $0x34] ss:$8 sps:$4 sm:$0xff]   ;;  %v779_v15 = vld [vmem:[#allocation7 + $0x30] ss:$8 sps:$4 sm:$0xff]  }
  0x4f   :  { %385 = vmatprep.subr.bf16.mxu1 %v771_v9  ;;  %v780_v16 = vld [vmem:[#allocation7 + $0x44] ss:$8 sps:$4 sm:$0xff]   ;;  %v782_v17 = vld [vmem:[#allocation7 + $0x40] ss:$8 sps:$4 sm:$0xff]   ;;  %v783_v18 = vld [vmem:[#allocation7 + $0x54] ss:$8 sps:$4 sm:$0xff]  }
  0x50   :  { %117 = vmatpush1.bf16.msra.mxu0 %v767_v4  ;;  %v785_v19 = vld [vmem:[#allocation7 + $0x50] ss:$8 sps:$4 sm:$0xff]   ;;  %v786_v20 = vld [vmem:[#allocation7 + $0x64] ss:$8 sps:$4 sm:$0xff]   ;;  %v788_v21 = vld [vmem:[#allocation7 + $0x60] ss:$8 sps:$4 sm:$0xff]  }
  0x51   :  { %v789_v22 = vld [vmem:[#allocation7 + $0x74] ss:$8 sps:$4 sm:$0xff]   ;;  %v791_v23 = vld [vmem:[#allocation7 + $0x70] ss:$8 sps:$4 sm:$0xff]   ;;  %v792_v24 = vld [vmem:[#allocation7 + $0x84] ss:$8 sps:$4 sm:$0xff]  }
  0x52   :  { %386 = vmatpush1.bf16.msra.mxu1 %v773_v11  ;;  %v794_v25 = vld [vmem:[#allocation7 + $0x80] ss:$8 sps:$4 sm:$0xff]   ;;  %v795_v26 = vld [vmem:[#allocation7 + $0x94] ss:$8 sps:$4 sm:$0xff]   ;;  %v797_v27 = vld [vmem:[#allocation7 + $0x90] ss:$8 sps:$4 sm:$0xff]  }
  0x53   :  { %671 = vmatmul.mubr.msk.bf16.vlgmr.msra.gmra.mrb[0].mxu0 %vm110_vm0, %v85_v10  ;;  %387 = vmatprep.subr.bf16.mxu1 %v774_v12  ;;  %v798_v28 = vld [vmem:[#allocation7 + $0xa4] ss:$8 sps:$4 sm:$0xff]   ;;  %v800_v29 = vld [vmem:[#allocation7 + $0xa0] ss:$8 sps:$4 sm:$0xff]   ;;  %v801_v30 = vld [vmem:[#allocation7 + $0xb4] ss:$8 sps:$4 sm:$0xff]  }
  0x54   :  { %v803_v31 = vld [vmem:[#allocation7 + $0xb0] ss:$8 sps:$4 sm:$0xff]   ;;  %v804_v32 = vld [vmem:[#allocation7 + $0xc4] ss:$8 sps:$4 sm:$0xff]   ;;  %v806_v33 = vld [vmem:[#allocation7 + $0xc0] ss:$8 sps:$4 sm:$0xff]  }
  0x55   :  { %v807_v34 = vld [vmem:[#allocation7 + $0xd4] ss:$8 sps:$4 sm:$0xff]   ;;  %v809_v35 = vld [vmem:[#allocation7 + $0xd0] ss:$8 sps:$4 sm:$0xff]   ;;  %v810_v36 = vld [vmem:[#allocation7 + $0xe4] ss:$8 sps:$4 sm:$0xff]  }
  0x56   :  { %388 = vmatpush1.bf16.msra.mxu1 %v776_v13  ;;  %v812_v37 = vld [vmem:[#allocation7 + $0xe0] ss:$8 sps:$4 sm:$0xff]   ;;  %v813_v38 = vld [vmem:[#allocation7 + $0xf4] ss:$8 sps:$4 sm:$0xff]   ;;  %v815_v39 = vld [vmem:[#allocation7 + $0xf0] ss:$8 sps:$4 sm:$0xff]  }
  0x57   :  { %389 = vmatprep.subr.bf16.mxu1 %v777_v14  ;;  %v816_v40 = vld [vmem:[#allocation8 + $0x40] sm:$0xff]   ;;  %v818_v42 = vld [vmem:[#allocation8 + $0x48] sm:$0xff]   ;;  %v820_v44 = vld [vmem:[#allocation8 + $0x50] sm:$0xff]   ;;  %v162_v52 = vshrl.u32 %v161_v51, 7  ;;  %s963_s30 = smov [#allocation10]  }
  0x58   :  { %v817_v41 = vld [vmem:[#allocation8] sm:$0xff]   ;;  %730 = vmatprep.subr.bf16.mxu0 %v816_v40  ;;  %v819_v43 = vld [vmem:[#allocation8 + $0x8] sm:$0xff]   ;;  %v821_v45 = vld [vmem:[#allocation8 + $0x10] sm:$0xff]   ;;  %s653_s8 = sshll.u32 %s963_s30, 4  ;;  %s654_s8 = int_to_ptr.vmem [resolvable:$true] %s653_s8 }
  0x59   :  { %731 = vmatpush3.bf16.msra.mxu0 %v817_v41  ;;  %v822_v46 = vld [vmem:[#allocation8 + $0x58] sm:$0xff]   ;;  %v824_v48 = vld [vmem:[#allocation8 + $0x60] sm:$0xff]   ;;  %v826_v50 = vld [vmem:[#allocation8 + $0x68] sm:$0xff]   ;;  %v163_v53 = vsub.s32 0, %v162_v52  ;;  %v167_v55 = vsub.s32 1, %v162_v52  ;;  %s924_s9 = scalar_lea.vmem %s654_s8, 128  ;;  %p929_p5 = scmp.lt.s32.totalorder %s654_s8, %s654_s8 }
  0x5a   :  { %390 = vmatpush1.bf16.msra.mxu1 %v779_v15  ;;  %732 = vmatprep.subr.bf16.mxu0 %v818_v42  ;;  %v823_v47 = vld [vmem:[#allocation8 + $0x18] sm:$0xff]   ;;  %v825_v49 = vld [vmem:[#allocation8 + $0x20] sm:$0xff]   ;;  %v159_v54 = vld [vmem:[%s1109_s2] sm:$0x3]  ;;  %p925_p4 = scmp.ne.s32.totalorder %s654_s8, %s924_s9  ;;  %p930_p6 = scmp.lt.s32.totalorder %s924_s9, %s924_s9 }
  0x5b   :  { %391 = vmatprep.subr.bf16.mxu1 %v780_v16  ;;  %v164_v56 = vrot.slane %v159_v54, %v163_v53  ;;  %v168_v57 = vrot.slane %v159_v54, %v167_v55  ;;  %v827_v11 = vld [vmem:[#allocation8 + $0x28] sm:$0xff]   ;;  %v828_v12 = vld [vmem:[#allocation8 + $0x70] sm:$0xff]   ;;  %v830_v14 = vld [vmem:[#allocation8 + $0x78] sm:$0xff]  }
  0x5c   :  { %v829_v13 = vld [vmem:[#allocation8 + $0x30] sm:$0xff]   ;;  %v831_v15 = vld [vmem:[#allocation8 + $0x38] sm:$0xff]   ;;  %p931_p7 = por %p930_p6, %p929_p5 }
  0x5d   :  { %733 = vmatpush3.bf16.msra.mxu0 %v819_v43  ;;  %v171_v58 = vpack.c.bf16 %v164_v56, %v164_v56  ;;  %v172_v59 = vpack.c.bf16 %v168_v57, %v168_v57  ;;  %v428_v16 = vld [vmem:[%s1111_s4] sm:$0x3] }
  0x5e   :  { %392 = vmatpush1.bf16.msra.mxu1 %v782_v17  ;;  %734 = vmatprep.subr.bf16.mxu0 %v820_v44  ;;  %v433_v17 = vrot.slane %v428_v16, %v163_v53  ;;  %p932_p8 = pnand %p931_p7, %p925_p4 }
  0x5f   :  { %393 = vmatprep.subr.bf16.mxu1 %v783_v18  ;;  %v174_v60 = vpack.i.b16 %v171_v58, %v171_v58  ;;  %v181_v61 = vpack.i.b16 %v172_v59, %v172_v59  ;;  %v437_v18 = vrot.slane %v428_v16, %v167_v55 }
  0x61   :  { %735 = vmatpush3.bf16.msra.mxu0 %v821_v45  ;;  %v179_v1 = vrot.slane %v174_v60, %v163_v53  ;;  %v186_v3 = vrot.slane %v181_v61, %v163_v53 }
  0x62   :  { %394 = vmatpush1.bf16.msra.mxu1 %v785_v19  ;;  %736 = vmatprep.subr.bf16.mxu0 %v822_v46  ;;  %v440_v19 = vpack.c.bf16 %v433_v17, %v433_v17 }
  0x63   :  { %395 = vmatprep.subr.bf16.mxu1 %v786_v20  ;;  %v441_v20 = vpack.c.bf16 %v437_v18, %v437_v18 }
  0x65   :  { %737 = vmatpush3.bf16.msra.mxu0 %v823_v47 }
  0x66   :  { %396 = vmatpush1.bf16.msra.mxu1 %v788_v21  ;;  %738 = vmatprep.subr.bf16.mxu0 %v824_v48  ;;  %v443_v21 = vpack.i.b16 %v440_v19, %v440_v19 }
  0x67   :  { %397 = vmatprep.subr.bf16.mxu1 %v789_v22  ;;  %v450_v22 = vpack.i.b16 %v441_v20, %v441_v20 }
  0x69   :  { %739 = vmatpush3.bf16.msra.mxu0 %v825_v49 }
  0x6a   :  { %398 = vmatpush1.bf16.msra.mxu1 %v791_v23  ;;  %740 = vmatprep.subr.bf16.mxu0 %v826_v50 }
  0x6b   :  { %399 = vmatprep.subr.bf16.mxu1 %v792_v24 }
  0x6d   :  { %741 = vmatpush3.bf16.msra.mxu0 %v827_v11 }
  0x6e   :  { %400 = vmatpush1.bf16.msra.mxu1 %v794_v25  ;;  %742 = vmatprep.subr.bf16.mxu0 %v828_v12  ;;  %v448_v25 = vrot.slane %v443_v21, %v163_v53 }
  0x6f   :  { %401 = vmatprep.subr.bf16.mxu1 %v795_v26 }
  0x71   :  { %743 = vmatpush3.bf16.msra.mxu0 %v829_v13 }
  0x72   :  { %402 = vmatpush1.bf16.msra.mxu1 %v797_v27  ;;  %744 = vmatprep.subr.bf16.mxu0 %v830_v14  ;;  %v455_v27 = vrot.slane %v450_v22, %v163_v53 }
  0x73   :  { %403 = vmatprep.subr.bf16.mxu1 %v798_v28 }
  0x75   :  { %745 = vmatpush3.bf16.msra.mxu0 %v831_v15 }
  0x76   :  { %404 = vmatpush1.bf16.msra.mxu1 %v800_v29 }
  0x77   :  { %405 = vmatprep.subr.bf16.mxu1 %v801_v30 }
  0x7a   :  { %406 = vmatpush1.bf16.msra.mxu1 %v803_v31 }
  0x7b   :  { %407 = vmatprep.subr.bf16.mxu1 %v804_v32 }
  0x7e   :  { %408 = vmatpush1.bf16.msra.mxu1 %v806_v33 }
  0x7f   :  { %409 = vmatprep.subr.bf16.mxu1 %v807_v34 }
  0x82   :  { %410 = vmatpush1.bf16.msra.mxu1 %v809_v35 }
  0x83   :  { %411 = vmatprep.subr.bf16.mxu1 %v810_v36  ;;  %v704_v36 = vld [vmem:[%s1113_s6] ss:$0 sm:$0xff] }
  0x86   :  { %412 = vmatpush1.bf16.msra.mxu1 %v812_v37 }
  0x87   :  { %413 = vmatprep.subr.bf16.mxu1 %v813_v38 }
  0x8a   :  { %414 = vmatpush1.bf16.msra.mxu1 %v815_v39 }
 0x126   :  { %v148_v62 = vpop.f32.mrb[0].mxu0 }
 0x127   :  { %v150_v63 = vpop.f32.mrb[1].mxu0 }
 0x128   :  { %v152_v2 = vpop.f32.mrb[2].mxu0 }
 0x129   :  { %v157_v4 = vpack.c.bf16 %v152_v2, %v148_v62  ;;  %v154_v5 = vpop.f32.mrb[3].mxu0 }
 0x12a   :  { %v158_v6 = vpack.c.bf16 %v154_v5, %v150_v63 }
 0x12b   :  { %v187_v7 = vadd.bf16 %v179_v1, %v157_v4 }
 0x12c   :  { %v188_v8 = vadd.bf16 %v186_v3, %v158_v6 }
 0x12d   :  { %v189_v10 = vmax.bf16 %v962_v0, %v187_v7 }
 0x12e   :  { %v190_v9 = vmax.bf16 %v962_v0, %v188_v8 }
 0x130   :  { %415 = vmatprep.mubr.bf16.mxu1 %v190_v9 }
 0x131   :  { %416 = vmatmul.mubr.bf16.vlgmr.msra.gmra.mrb[0].mxu1 %v189_v10 }
 0x204   :  { %v417_v23 = vpop.f32.mrb[0].mxu1 }
 0x205   :  { %v419_v24 = vpop.f32.mrb[1].mxu1 }
 0x206   :  { %v421_v26 = vpop.f32.mrb[2].mxu1 }
 0x207   :  { %v426_v28 = vpack.c.bf16 %v421_v26, %v417_v23  ;;  %v423_v29 = vpop.f32.mrb[3].mxu1 }
 0x208   :  { %v427_v30 = vpack.c.bf16 %v423_v29, %v419_v24 }
 0x209   :  { %v456_v31 = vadd.bf16 %v448_v25, %v426_v28 }
 0x20a   :  { %v457_v32 = vadd.bf16 %v455_v27, %v427_v30 }
 0x20b   :  { %v458_v34 = vmax.bf16 %v962_v0, %v456_v31 }
 0x20c   :  { %v459_v33 = vmax.bf16 %v962_v0, %v457_v32 }
 0x20e   :  { %627 = vmatprep.mubr.bf16.mxu0 %v459_v33 }
 0x20f   :  { %628 = vmatmul.mubr.bf16.vlgmr.msra.gmra.mrb[4].mxu0 %v458_v34 }
 0x2e2   :  { %v746_v35 = vpop.f32.mrb[4].mxu0 }
 0x2e3   :  { %v747_v37 = vpop.f32.mrb[5].mxu0 }
 0x2e4   :  { %v748_v38 = vadd.f32 %v747_v37, %v746_v35  ;;  %v749_v39 = vpop.f32.mrb[6].mxu0 }
 0x2e5   :  { %v750_v40 = vpop.f32.mrb[7].mxu0 }
 0x2e6   :  { %v630_v41 = vadd.f32 %v748_v38, %v704_v36  ;;  %v751_v42 = vadd.f32 %v750_v40, %v749_v39 }
 0x2e8   :  { %v633_v43 = vadd.f32 %v751_v42, %v704_v36  ;;  %832 = vtanh.f32 %v630_v41 }
 0x2ea   :  { %834 = vtanh.f32 %v633_v43 }
 0x2f2   :  { %v833_v44 = vpop.eup %832 }
 0x2f4   :  { %v835_v0 = vpop.eup %834 }
 0x2f5   :  { %v728_v45 = vpack.c.bf16 %v835_v0, %v833_v44 }
 0x2f7   :  { %729 = vst [vmem:[#allocation10] sm:$0xff] %v728_v45  }
 0x2f8   :  { %935 = shalt.err (!%p932_p8)
}
 0x2f9   :  { %s936_s11 = scalar_lea.hbm %s1114_s7, 128 }
 0x2fa   :  { %p937_p9 = scmp.ne.s32.totalorder %s1114_s7, %s936_s11  ;;  %p940_p10 = scmp.lt.u32.totalorder %s936_s11, %s1114_s7 }
 0x2fc   :  { %p942_p11 = pnand %p940_p10, %p937_p9 }
 0x2fe   :  { %945 = shalt.err (!%p942_p11)
}
 0x2ff   :  { %659 = dma.vmem_to_hbm [thread:$0]  %s654_s8, 128, %s1114_s7, [#allocation4], %s960_s3, %s960_s3, %s961_s13  }
 0x300   :  { %952 = dma.done.wait [#allocation4], 128  }
 0x301   :  { %953 = vsyncadd [#allocation4], 4294967168 }
 0x302   :  { %663 = vsyncpa [#allocation3], 1 }
 0x303   :  { %664 = vsyncpa [#allocation6], 1 }
 0x304   :  { %665 = vsyncpa [#allocation9], 1 }
 0x305   :  { %666 = vsyncpa [#allocation4], 1 }

// kernel: tpu_custom_call.1
= control target key start
LH: loop header
LB: loop body
LE: loop exit
PB: predicated region body
PF: predicated region fallthrough
CT: control target
= control target key end

     0   :  { %12 = vsyncpa [#allocation3], 0  ;;  %s1107_s0 = inlined_call_operand.hbm [shape: f32[16,32], index: 0, kind: input, shape index: {}]   ;;  %s1108_s1 = inlined_call_operand.hbm [shape: bf16[32,256], index: 1, kind: input, shape index: {}]   ;;  %s1109_s2 = inlined_call_operand.vmem [shape: f32[1,256], index: 2, kind: input, shape index: {}]   ;;  %s1110_s3 = inlined_call_operand.hbm [shape: bf16[256,256], index: 3, kind: input, shape index: {}]   ;;  %s1111_s4 = inlined_call_operand.vmem [shape: f32[1,256], index: 4, kind: input, shape index: {}]   ;;  %s1112_s5 = inlined_call_operand.hbm [shape: bf16[256,128], index: 5, kind: input, shape index: {}]   ;;  %s1113_s6 = inlined_call_operand.vmem [shape: f32[1,128], index: 6, kind: input, shape index: {}]   ;;  %s1114_s7 = inlined_call_operand.hbm [shape: bf16[16,128], index: 7, kind: output, shape index: {}]  }
   0x1   :  { %13 = vsyncpa [#allocation6], 0 }
   0x2   :  { %14 = vsyncpa [#allocation9], 0 }
   0x3   :  { %15 = vsyncpa [#allocation4], 0  ;;  %s954_s24 = smov [#allocation5]   ;;  %s955_s26 = smov [#allocation2]  }
   0x4   :  { %s33_s25 = sshll.u32 %s954_s24, 4  ;;  %s21_s27 = sshll.u32 %s955_s26, 4  ;;  %s34_s25 = int_to_ptr.vmem [resolvable:$true] %s33_s25  ;;  %s1004_s27 = int_to_ptr.vmem [resolvable:$true] %s21_s27 }
   0x5   :  { %s836_s30 = scalar_lea.hbm %s1108_s1, 512 }
   0x6   :  { %p837_p0 = scmp.ne.s32.totalorder %s1108_s1, %s836_s30  ;;  %p840_p1 = scmp.lt.u32.totalorder %s836_s30, %s1108_s1 }
   0x8   :  { %p842_p2 = pnand %p840_p1, %p837_p0 }
   0xa   :  { %845 = shalt.err (!%p842_p2)
}
   0xb   :  { %s846_s12 = scalar_lea.vmem %s34_s25, 512  ;;  %p851_p4 = scmp.lt.s32.totalorder %s34_s25, %s34_s25 }
   0xc   :  { %p847_p3 = scmp.ne.s32.totalorder %s34_s25, %s846_s12  ;;  %p852_p5 = scmp.lt.s32.totalorder %s846_s12, %s846_s12 }
   0xe   :  { %p853_p6 = por %p852_p5, %p851_p4 }
  0x10   :  { %p854_p7 = pnand %p853_p6, %p847_p3 }
  0x12   :  { %857 = shalt.err (!%p854_p7)
}
  0x13   :  { %s956_s13 = smov 128   ;;  %s957_s14 = smov 8  }
  0x14   :  { %39 = dma.hbm_to_vmem [thread:$0]  %s1108_s1, 512, %s34_s25, [#allocation6], %s956_s13, %s956_s13, %s957_s14  }
  0x15   :  { %s858_s19 = scalar_lea.hbm %s1107_s0, 256 }
  0x16   :  { %p859_p8 = scmp.ne.s32.totalorder %s1107_s0, %s858_s19  ;;  %p862_p9 = scmp.lt.u32.totalorder %s858_s19, %s1107_s0 }
  0x18   :  { %p864_p10 = pnand %p862_p9, %p859_p8 }
  0x1a   :  { %867 = shalt.err (!%p864_p10)
}
  0x1b   :  { %s868_s24 = scalar_lea.vmem %s1004_s27, 256  ;;  %p873_p12 = scmp.lt.s32.totalorder %s1004_s27, %s1004_s27 }
  0x1c   :  { %p869_p11 = scmp.ne.s32.totalorder %s1004_s27, %s868_s24  ;;  %p874_p13 = scmp.lt.s32.totalorder %s868_s24, %s868_s24 }
  0x1e   :  { %p875_p0 = por %p874_p13, %p873_p12 }
  0x20   :  { %p876_p1 = pnand %p875_p0, %p869_p11 }
  0x22   :  { %879 = shalt.err (!%p876_p1)
}
  0x23   :  { %27 = dma.hbm_to_vmem [thread:$0]  %s1107_s0, 256, %s1004_s27, [#allocation3], %s956_s13, %s956_s13, %s957_s14  }
  0x24   :  { %s958_s26 = smov [#allocation7]   ;;  %s959_s29 = smov [#allocation8]  }
  0x25   :  { %s47_s28 = sshll.u32 %s958_s26, 4  ;;  %s61_s30 = sshll.u32 %s959_s29, 4  ;;  %s48_s28 = int_to_ptr.vmem [resolvable:$true] %s47_s28  ;;  %s1041_s30 = int_to_ptr.vmem [resolvable:$true] %s61_s30 }
  0x26   :  { %s880_s10 = scalar_lea.hbm %s1110_s3, 4096 }
  0x27   :  { %p881_p2 = scmp.ne.s32.totalorder %s1110_s3, %s880_s10  ;;  %p884_p3 = scmp.lt.u32.totalorder %s880_s10, %s1110_s3 }
  0x29   :  { %p886_p4 = pnand %p884_p3, %p881_p2 }
  0x2b   :  { %889 = shalt.err (!%p886_p4)
}
  0x2c   :  { %s890_s0 = scalar_lea.vmem %s48_s28, 4096  ;;  %p895_p6 = scmp.lt.s32.totalorder %s48_s28, %s48_s28 }
  0x2d   :  { %p891_p5 = scmp.ne.s32.totalorder %s48_s28, %s890_s0  ;;  %p896_p7 = scmp.lt.s32.totalorder %s890_s0, %s890_s0 }
  0x2f   :  { %p897_p8 = por %p896_p7, %p895_p6 }
  0x31   :  { %p898_p9 = pnand %p897_p8, %p891_p5 }
  0x33   :  { %901 = shalt.err (!%p898_p9)
}
  0x34   :  { %53 = dma.hbm_to_vmem [thread:$0]  %s1110_s3, 4096, %s48_s28, [#allocation6], %s956_s13, %s956_s13, %s957_s14  }
  0x35   :  { %s902_s20 = scalar_lea.hbm %s1112_s5, 2048 }
  0x36   :  { %p903_p10 = scmp.ne.s32.totalorder %s1112_s5, %s902_s20  ;;  %p906_p11 = scmp.lt.u32.totalorder %s902_s20, %s1112_s5 }
  0x38   :  { %p908_p12 = pnand %p906_p11, %p903_p10 }
  0x3a   :  { %911 = shalt.err (!%p908_p12)
}
  0x3b   :  { %s912_s1 = scalar_lea.vmem %s1041_s30, 2048  ;;  %p917_p0 = scmp.lt.s32.totalorder %s1041_s30, %s1041_s30 }
  0x3c   :  { %p913_p13 = scmp.ne.s32.totalorder %s1041_s30, %s912_s1  ;;  %p918_p1 = scmp.lt.s32.totalorder %s912_s1, %s912_s1 }
  0x3e   :  { %p919_p2 = por %p918_p1, %p917_p0 }
  0x40   :  { %p920_p3 = pnand %p919_p2, %p913_p13 }
  0x42   :  { %923 = shalt.err (!%p920_p3)
}
  0x43   :  { %s960_s3 = smov 64   ;;  %s961_s13 = smov 4  }
  0x44   :  { %67 = dma.hbm_to_vmem [thread:$0]  %s1112_s5, 2048, %s1041_s30, [#allocation9], %s960_s3, %s960_s3, %s961_s13  }
  0x45   :  { %946 = dma.done.wait [#allocation3], 256  }
  0x46   :  { %947 = vsyncadd [#allocation3], 4294967040 }
  0x47   :  { %948 = dma.done.wait [#allocation6], 4608  }
  0x48   :  { %949 = vsyncadd [#allocation6], 4294962688 }
  0x49   :  { %950 = dma.done.wait [#allocation9], 2048  }
  0x4a   :  { %951 = vsyncadd [#allocation9], 4294965248  ;;  %v962_v0 = vmov 0   ;;  %v762_v1 = vld [vmem:[#allocation5 + $0x4] ss:$8 sps:$4 sm:$0xff]   ;;  %v83_v5 = vld [vmem:[#allocation2] sm:$0xff]  ;;  %v161_v51 = vlaneseq }
  0x4b   :  { %146 = vmatprep.mubr.bf16.mxu0 %v962_v0  ;;  %v764_v2 = vld [vmem:[#allocation5] ss:$8 sps:$4 sm:$0xff]   ;;  %114 = vmatprep.subr.bf16.mxu0 %v762_v1  ;;  %v765_v3 = vld [vmem:[#allocation5 + $0x14] ss:$8 sps:$4 sm:$0xff]   ;;  %v767_v4 = vld [vmem:[#allocation5 + $0x10] ss:$8 sps:$4 sm:$0xff]  }
  0x4c   :  { %115 = vmatpush1.bf16.msra.mxu0 %v764_v2  ;;  %v84_v6 = vld [vmem:[#allocation2 + $0x8] sm:$0xff]  ;;  %v768_v7 = vld [vmem:[#allocation7 + $0x4] ss:$8 sps:$4 sm:$0xff]   ;;  %v770_v8 = vld [vmem:[#allocation7] ss:$8 sps:$4 sm:$0xff]   ;;  %vm110_vm0 = vcmask 261120  }
  0x4d   :  { %116 = vmatprep.subr.bf16.mxu0 %v765_v3  ;;  %v771_v9 = vld [vmem:[#allocation7 + $0x14] ss:$8 sps:$4 sm:$0xff]   ;;  %v85_v10 = vpack.c.bf16 %v84_v6, %v83_v5  ;;  %383 = vmatprep.subr.bf16.mxu1 %v768_v7  ;;  %v773_v11 = vld [vmem:[#allocation7 + $0x10] ss:$8 sps:$4 sm:$0xff]   ;;  %v774_v12 = vld [vmem:[#allocation7 + $0x24] ss:$8 sps:$4 sm:$0xff]  }
  0x4e   :  { %384 = vmatpush1.bf16.msra.mxu1 %v770_v8  ;;  %v776_v13 = vld [vmem:[#allocation7 + $0x20] ss:$8 sps:$4 sm:$0xff]   ;;  %v777_v14 = vld [vmem:[#allocation7 + $0x34] ss:$8 sps:$4 sm:$0xff]   ;;  %v779_v15 = vld [vmem:[#allocation7 + $0x30] ss:$8 sps:$4 sm:$0xff]  }
  0x4f   :  { %385 = vmatprep.subr.bf16.mxu1 %v771_v9  ;;  %v780_v16 = vld [vmem:[#allocation7 + $0x44] ss:$8 sps:$4 sm:$0xff]   ;;  %v782_v17 = vld [vmem:[#allocation7 + $0x40] ss:$8 sps:$4 sm:$0xff]   ;;  %v783_v18 = vld [vmem:[#allocation7 + $0x54] ss:$8 sps:$4 sm:$0xff]  }
  0x50   :  { %117 = vmatpush1.bf16.msra.mxu0 %v767_v4  ;;  %v785_v19 = vld [vmem:[#allocation7 + $0x50] ss:$8 sps:$4 sm:$0xff]   ;;  %v786_v20 = vld [vmem:[#allocation7 + $0x64] ss:$8 sps:$4 sm:$0xff]   ;;  %v788_v21 = vld [vmem:[#allocation7 + $0x60] ss:$8 sps:$4 sm:$0xff]  }
  0x51   :  { %v789_v22 = vld [vmem:[#allocation7 + $0x74] ss:$8 sps:$4 sm:$0xff]   ;;  %v791_v23 = vld [vmem:[#allocation7 + $0x70] ss:$8 sps:$4 sm:$0xff]   ;;  %v792_v24 = vld [vmem:[#allocation7 + $0x84] ss:$8 sps:$4 sm:$0xff]  }
  0x52   :  { %386 = vmatpush1.bf16.msra.mxu1 %v773_v11  ;;  %v794_v25 = vld [vmem:[#allocation7 + $0x80] ss:$8 sps:$4 sm:$0xff]   ;;  %v795_v26 = vld [vmem:[#allocation7 + $0x94] ss:$8 sps:$4 sm:$0xff]   ;;  %v797_v27 = vld [vmem:[#allocation7 + $0x90] ss:$8 sps:$4 sm:$0xff]  }
  0x53   :  { %671 = vmatmul.mubr.msk.bf16.vlgmr.msra.gmra.mrb[0].mxu0 %vm110_vm0, %v85_v10  ;;  %387 = vmatprep.subr.bf16.mxu1 %v774_v12  ;;  %v798_v28 = vld [vmem:[#allocation7 + $0xa4] ss:$8 sps:$4 sm:$0xff]   ;;  %v800_v29 = vld [vmem:[#allocation7 + $0xa0] ss:$8 sps:$4 sm:$0xff]   ;;  %v801_v30 = vld [vmem:[#allocation7 + $0xb4] ss:$8 sps:$4 sm:$0xff]  }
  0x54   :  { %v803_v31 = vld [vmem:[#allocation7 + $0xb0] ss:$8 sps:$4 sm:$0xff]   ;;  %v804_v32 = vld [vmem:[#allocation7 + $0xc4] ss:$8 sps:$4 sm:$0xff]   ;;  %v806_v33 = vld [vmem:[#allocation7 + $0xc0] ss:$8 sps:$4 sm:$0xff]  }
  0x55   :  { %v807_v34 = vld [vmem:[#allocation7 + $0xd4] ss:$8 sps:$4 sm:$0xff]   ;;  %v809_v35 = vld [vmem:[#allocation7 + $0xd0] ss:$8 sps:$4 sm:$0xff]   ;;  %v810_v36 = vld [vmem:[#allocation7 + $0xe4] ss:$8 sps:$4 sm:$0xff]  }
  0x56   :  { %388 = vmatpush1.bf16.msra.mxu1 %v776_v13  ;;  %v812_v37 = vld [vmem:[#allocation7 + $0xe0] ss:$8 sps:$4 sm:$0xff]   ;;  %v813_v38 = vld [vmem:[#allocation7 + $0xf4] ss:$8 sps:$4 sm:$0xff]   ;;  %v815_v39 = vld [vmem:[#allocation7 + $0xf0] ss:$8 sps:$4 sm:$0xff]  }
  0x57   :  { %389 = vmatprep.subr.bf16.mxu1 %v777_v14  ;;  %v816_v40 = vld [vmem:[#allocation8 + $0x40] sm:$0xff]   ;;  %v818_v42 = vld [vmem:[#allocation8 + $0x48] sm:$0xff]   ;;  %v820_v44 = vld [vmem:[#allocation8 + $0x50] sm:$0xff]   ;;  %v162_v52 = vshrl.u32 %v161_v51, 7  ;;  %s963_s30 = smov [#allocation10]  }
  0x58   :  { %v817_v41 = vld [vmem:[#allocation8] sm:$0xff]   ;;  %730 = vmatprep.subr.bf16.mxu0 %v816_v40  ;;  %v819_v43 = vld [vmem:[#allocation8 + $0x8] sm:$0xff]   ;;  %v821_v45 = vld [vmem:[#allocation8 + $0x10] sm:$0xff]   ;;  %s653_s8 = sshll.u32 %s963_s30, 4  ;;  %s654_s8 = int_to_ptr.vmem [resolvable:$true] %s653_s8 }
  0x59   :  { %731 = vmatpush3.bf16.msra.mxu0 %v817_v41  ;;  %v822_v46 = vld [vmem:[#allocation8 + $0x58] sm:$0xff]   ;;  %v824_v48 = vld [vmem:[#allocation8 + $0x60] sm:$0xff]   ;;  %v826_v50 = vld [vmem:[#allocation8 + $0x68] sm:$0xff]   ;;  %v163_v53 = vsub.s32 0, %v162_v52  ;;  %v167_v55 = vsub.s32 1, %v162_v52  ;;  %s924_s9 = scalar_lea.vmem %s654_s8, 128  ;;  %p929_p5 = scmp.lt.s32.totalorder %s654_s8, %s654_s8 }
  0x5a   :  { %390 = vmatpush1.bf16.msra.mxu1 %v779_v15  ;;  %732 = vmatprep.subr.bf16.mxu0 %v818_v42  ;;  %v823_v47 = vld [vmem:[#allocation8 + $0x18] sm:$0xff]   ;;  %v825_v49 = vld [vmem:[#allocation8 + $0x20] sm:$0xff]   ;;  %v159_v54 = vld [vmem:[%s1109_s2] sm:$0x3]  ;;  %p925_p4 = scmp.ne.s32.totalorder %s654_s8, %s924_s9  ;;  %p930_p6 = scmp.lt.s32.totalorder %s924_s9, %s924_s9 }
  0x5b   :  { %391 = vmatprep.subr.bf16.mxu1 %v780_v16  ;;  %v164_v56 = vrot.slane %v159_v54, %v163_v53  ;;  %v168_v57 = vrot.slane %v159_v54, %v167_v55  ;;  %v827_v11 = vld [vmem:[#allocation8 + $0x28] sm:$0xff]   ;;  %v828_v12 = vld [vmem:[#allocation8 + $0x70] sm:$0xff]   ;;  %v830_v14 = vld [vmem:[#allocation8 + $0x78] sm:$0xff]  }
  0x5c   :  { %v829_v13 = vld [vmem:[#allocation8 + $0x30] sm:$0xff]   ;;  %v831_v15 = vld [vmem:[#allocation8 + $0x38] sm:$0xff]   ;;  %p931_p7 = por %p930_p6, %p929_p5 }
  0x5d   :  { %733 = vmatpush3.bf16.msra.mxu0 %v819_v43  ;;  %v171_v58 = vpack.c.bf16 %v164_v56, %v164_v56  ;;  %v172_v59 = vpack.c.bf16 %v168_v57, %v168_v57  ;;  %v428_v16 = vld [vmem:[%s1111_s4] sm:$0x3] }
  0x5e   :  { %392 = vmatpush1.bf16.msra.mxu1 %v782_v17  ;;  %734 = vmatprep.subr.bf16.mxu0 %v820_v44  ;;  %v433_v17 = vrot.slane %v428_v16, %v163_v53  ;;  %p932_p8 = pnand %p931_p7, %p925_p4 }
  0x5f   :  { %393 = vmatprep.subr.bf16.mxu1 %v783_v18  ;;  %v174_v60 = vpack.i.b16 %v171_v58, %v171_v58  ;;  %v181_v61 = vpack.i.b16 %v172_v59, %v172_v59  ;;  %v437_v18 = vrot.slane %v428_v16, %v167_v55 }
  0x61   :  { %735 = vmatpush3.bf16.msra.mxu0 %v821_v45  ;;  %v179_v1 = vrot.slane %v174_v60, %v163_v53  ;;  %v186_v3 = vrot.slane %v181_v61, %v163_v53 }
  0x62   :  { %394 = vmatpush1.bf16.msra.mxu1 %v785_v19  ;;  %736 = vmatprep.subr.bf16.mxu0 %v822_v46  ;;  %v440_v19 = vpack.c.bf16 %v433_v17, %v433_v17 }
  0x63   :  { %395 = vmatprep.subr.bf16.mxu1 %v786_v20  ;;  %v441_v20 = vpack.c.bf16 %v437_v18, %v437_v18 }
  0x65   :  { %737 = vmatpush3.bf16.msra.mxu0 %v823_v47 }
  0x66   :  { %396 = vmatpush1.bf16.msra.mxu1 %v788_v21  ;;  %738 = vmatprep.subr.bf16.mxu0 %v824_v48  ;;  %v443_v21 = vpack.i.b16 %v440_v19, %v440_v19 }
  0x67   :  { %397 = vmatprep.subr.bf16.mxu1 %v789_v22  ;;  %v450_v22 = vpack.i.b16 %v441_v20, %v441_v20 }
  0x69   :  { %739 = vmatpush3.bf16.msra.mxu0 %v825_v49 }
  0x6a   :  { %398 = vmatpush1.bf16.msra.mxu1 %v791_v23  ;;  %740 = vmatprep.subr.bf16.mxu0 %v826_v50 }
  0x6b   :  { %399 = vmatprep.subr.bf16.mxu1 %v792_v24 }
  0x6d   :  { %741 = vmatpush3.bf16.msra.mxu0 %v827_v11 }
  0x6e   :  { %400 = vmatpush1.bf16.msra.mxu1 %v794_v25  ;;  %742 = vmatprep.subr.bf16.mxu0 %v828_v12  ;;  %v448_v25 = vrot.slane %v443_v21, %v163_v53 }
  0x6f   :  { %401 = vmatprep.subr.bf16.mxu1 %v795_v26 }
  0x71   :  { %743 = vmatpush3.bf16.msra.mxu0 %v829_v13 }
  0x72   :  { %402 = vmatpush1.bf16.msra.mxu1 %v797_v27  ;;  %744 = vmatprep.subr.bf16.mxu0 %v830_v14  ;;  %v455_v27 = vrot.slane %v450_v22, %v163_v53 }
  0x73   :  { %403 = vmatprep.subr.bf16.mxu1 %v798_v28 }
  0x75   :  { %745 = vmatpush3.bf16.msra.mxu0 %v831_v15 }
  0x76   :  { %404 = vmatpush1.bf16.msra.mxu1 %v800_v29 }
  0x77   :  { %405 = vmatprep.subr.bf16.mxu1 %v801_v30 }
  0x7a   :  { %406 = vmatpush1.bf16.msra.mxu1 %v803_v31 }
  0x7b   :  { %407 = vmatprep.subr.bf16.mxu1 %v804_v32 }
  0x7e   :  { %408 = vmatpush1.bf16.msra.mxu1 %v806_v33 }
  0x7f   :  { %409 = vmatprep.subr.bf16.mxu1 %v807_v34 }
  0x82   :  { %410 = vmatpush1.bf16.msra.mxu1 %v809_v35 }
  0x83   :  { %411 = vmatprep.subr.bf16.mxu1 %v810_v36  ;;  %v704_v36 = vld [vmem:[%s1113_s6] ss:$0 sm:$0xff] }
  0x86   :  { %412 = vmatpush1.bf16.msra.mxu1 %v812_v37 }
  0x87   :  { %413 = vmatprep.subr.bf16.mxu1 %v813_v38 }
  0x8a   :  { %414 = vmatpush1.bf16.msra.mxu1 %v815_v39 }
 0x126   :  { %v148_v62 = vpop.f32.mrb[0].mxu0 }
 0x127   :  { %v150_v63 = vpop.f32.mrb[1].mxu0 }
 0x128   :  { %v152_v2 = vpop.f32.mrb[2].mxu0 }
 0x129   :  { %v157_v4 = vpack.c.bf16 %v152_v2, %v148_v62  ;;  %v154_v5 = vpop.f32.mrb[3].mxu0 }
 0x12a   :  { %v158_v6 = vpack.c.bf16 %v154_v5, %v150_v63 }
 0x12b   :  { %v187_v7 = vadd.bf16 %v179_v1, %v157_v4 }
 0x12c   :  { %v188_v8 = vadd.bf16 %v186_v3, %v158_v6 }
 0x12d   :  { %v189_v10 = vmax.bf16 %v962_v0, %v187_v7 }
 0x12e   :  { %v190_v9 = vmax.bf16 %v962_v0, %v188_v8 }
 0x130   :  { %415 = vmatprep.mubr.bf16.mxu1 %v190_v9 }
 0x131   :  { %416 = vmatmul.mubr.bf16.vlgmr.msra.gmra.mrb[0].mxu1 %v189_v10 }
 0x204   :  { %v417_v23 = vpop.f32.mrb[0].mxu1 }
 0x205   :  { %v419_v24 = vpop.f32.mrb[1].mxu1 }
 0x206   :  { %v421_v26 = vpop.f32.mrb[2].mxu1 }
 0x207   :  { %v426_v28 = vpack.c.bf16 %v421_v26, %v417_v23  ;;  %v423_v29 = vpop.f32.mrb[3].mxu1 }
 0x208   :  { %v427_v30 = vpack.c.bf16 %v423_v29, %v419_v24 }
 0x209   :  { %v456_v31 = vadd.bf16 %v448_v25, %v426_v28 }
 0x20a   :  { %v457_v32 = vadd.bf16 %v455_v27, %v427_v30 }
 0x20b   :  { %v458_v34 = vmax.bf16 %v962_v0, %v456_v31 }
 0x20c   :  { %v459_v33 = vmax.bf16 %v962_v0, %v457_v32 }
 0x20e   :  { %627 = vmatprep.mubr.bf16.mxu0 %v459_v33 }
 0x20f   :  { %628 = vmatmul.mubr.bf16.vlgmr.msra.gmra.mrb[4].mxu0 %v458_v34 }
 0x2e2   :  { %v746_v35 = vpop.f32.mrb[4].mxu0 }
 0x2e3   :  { %v747_v37 = vpop.f32.mrb[5].mxu0 }
 0x2e4   :  { %v748_v38 = vadd.f32 %v747_v37, %v746_v35  ;;  %v749_v39 = vpop.f32.mrb[6].mxu0 }
 0x2e5   :  { %v750_v40 = vpop.f32.mrb[7].mxu0 }
 0x2e6   :  { %v630_v41 = vadd.f32 %v748_v38, %v704_v36  ;;  %v751_v42 = vadd.f32 %v750_v40, %v749_v39 }
 0x2e8   :  { %v633_v43 = vadd.f32 %v751_v42, %v704_v36  ;;  %832 = vtanh.f32 %v630_v41 }
 0x2ea   :  { %834 = vtanh.f32 %v633_v43 }
 0x2f2   :  { %v833_v44 = vpop.eup %832 }
 0x2f4   :  { %v835_v0 = vpop.eup %834 }
 0x2f5   :  { %v728_v45 = vpack.c.bf16 %v835_v0, %v833_v44 }
 0x2f7   :  { %729 = vst [vmem:[#allocation10] sm:$0xff] %v728_v45  }
 0x2f8   :  { %935 = shalt.err (!%p932_p8)
}
 0x2f9   :  { %s936_s11 = scalar_lea.hbm %s1114_s7, 128 }
 0x2fa   :  { %p937_p9 = scmp.ne.s32.totalorder %s1114_s7, %s936_s11  ;;  %p940_p10 = scmp.lt.u32.totalorder %s936_s11, %s1114_s7 }
 0x2fc   :  { %p942_p11 = pnand %p940_p10, %p937_p9 }
 0x2fe   :  { %945 = shalt.err (!%p942_p11)
}
 0x2ff   :  { %659 = dma.vmem_to_hbm [thread:$0]  %s654_s8, 128, %s1114_s7, [#allocation4], %s960_s3, %s960_s3, %s961_s13  }
 0x300   :  { %952 = dma.done.wait [#allocation4], 128  }
 0x301   :  { %953 = vsyncadd [#allocation4], 4294967168 }
 0x302   :  { %663 = vsyncpa [#allocation3], 1 }
 0x303   :  { %664 = vsyncpa [#allocation6], 1 }
 0x304   :  { %665 = vsyncpa [#allocation9], 1 }
 0x305   :  { %666 = vsyncpa [#allocation4], 1 }

</bundles_post_ra>
